<compile_context>
chip_gen: v6e
topology: v6e:2x2x1
jax: 0.10.0
libtpu: 0.0.40
codegen_flags: <defaults>
</compile_context>

<pallas_src>
import functools

import jax
import jax.numpy as jnp
from jax import lax
from jax.experimental import pallas as pl
from jax.experimental.pallas import tpu as pltpu

NEG_SLOPE = 0.01  # nn.LeakyReLU default negative_slope
BN_EPS = 1e-5     # nn.BatchNorm2d default eps


def _leaky(v):
    return jnp.where(v >= 0, v, NEG_SLOPE * v)


def residual_kernel(x_ref, w1_ref, s1_ref, b1_ref, w2_ref, s2_ref, b2_ref,
                    edge_ref, o_ref, hpad_ref, *, H, W):
    # x_ref   : (1, C, H*W)  f32   input tile (one batch element), lane-dense
    # w1_ref  : (Cm, C)      bf16  1x1 conv weights (torch OI layout, squeezed)
    # s1/b1   : (Cm, 1)      f32   folded BN1 scale / bias
    # w2_ref  : (C, 9*Cm)    bf16  3x3 conv weights flattened to (out, tap*in)
    # s2/b2   : (C, 1)       f32   folded BN2 scale / bias
    # edge_ref: (2, H*W)     f32   row0: 0 on left image column, row1: 0 on right
    # hpad_ref: (Cm, PADL + H*W + PADT)  f32 VMEM  zero-margined activation
    HW = H * W
    Cm = w1_ref.shape[0]
    PADL = ((W + 1 + 127) // 128) * 128   # lane-aligned left zero margin
    PADT = ((W + 127) // 128) * 128       # lane-aligned right zero margin

    xT = x_ref[0]                                            # (C, HW) f32

    # ---- 1x1 conv (bf16 MXU operands, f32 accumulation) + BN + LeakyReLU ----
    h = jnp.dot(w1_ref[...], xT.astype(jnp.bfloat16),
                preferred_element_type=jnp.float32)          # (Cm, HW) f32
    h = _leaky(h * s1_ref[...] + b1_ref[...])

    # ---- zero only the halo margins (cheap, megacore-safe), then the interior
    #      (fully overwritten every step) ----
    hpad_ref[:, :PADL] = jnp.zeros((Cm, PADL), jnp.float32)
    hpad_ref[:, PADL + HW:] = jnp.zeros((Cm, PADT), jnp.float32)
    hpad_ref[:, PADL:PADL + HW] = h                          # lane-aligned store

    # Edge masks, broadcast ONCE (JAX does not CSE broadcast_in_dim).
    nl = jnp.broadcast_to(edge_ref[0:1, :], (Cm, HW))  # kill left-border taps
    nr = jnp.broadcast_to(edge_ref[1:2, :], (Cm, HW))  # kill right-border taps

    # ---- build the nine 3x3 taps: 3 row loads + 6 XLU rolls, bf16 at creation.
    # Circular wrap lanes introduced by the rolls are exactly the lanes the
    # nl/nr masks zero, so roll + mask reproduces SAME padding. ----
    patches = []
    for dy in range(3):
        start = PADL + (dy - 1) * W
        c = hpad_ref[:, start:start + HW]                    # (Cm, HW) f32
        left = pltpu.roll(c, 1, 1) * nl                      # dx = 0
        right = pltpu.roll(c, HW - 1, 1) * nr                # dx = 2
        patches += [left.astype(jnp.bfloat16),
                    c.astype(jnp.bfloat16),
                    right.astype(jnp.bfloat16)]
    col = jnp.concatenate(patches, axis=0)                   # (9*Cm, HW) bf16

    # ---- 3x3 conv as ONE fused matmul: (C, 9*Cm) @ (9*Cm, HW) ----
    y = jnp.dot(w2_ref[...], col, preferred_element_type=jnp.float32)
    y = _leaky(y * s2_ref[...] + b2_ref[...])

    # ---- residual add (f32) + lane-dense store ----
    o_ref[0] = y + xT


def residual_layer(x_nchw, w1, s1, b1, w2col, s2, b2):
    """x_nchw: (N, C, H, W) float32 -> (N, C, H, W) float32."""
    N, C, H, W = x_nchw.shape
    Cm = w1.shape[0]
    HW = H * W
    PADL = ((W + 1 + 127) // 128) * 128
    PADT = ((W + 127) // 128) * 128

    x3 = x_nchw.reshape(N, C, HW)          # free reshape, no transpose needed

    # Edge masks (precomputed wrapper-side; avoids in-kernel integer mod).
    xcoord = jnp.arange(HW, dtype=jnp.int32) % W
    edge = jnp.stack([(xcoord != 0), (xcoord != W - 1)]).astype(jnp.float32)

    # bf16 weights for the MXU (f32 accumulation inside the kernel).
    w1b = w1.astype(jnp.bfloat16)
    w2b = w2col.astype(jnp.bfloat16)

    kernel = functools.partial(residual_kernel, H=H, W=W)

    out = pl.pallas_call(
        kernel,
        out_shape=jax.ShapeDtypeStruct((N, C, HW), jnp.float32),
        grid_spec=pltpu.PrefetchScalarGridSpec(
            num_scalar_prefetch=0,
            grid=(N,),
            in_specs=[
                pl.BlockSpec((1, C, HW), lambda n: (n, 0, 0)),   # x
                pl.BlockSpec((Cm, C), lambda n: (0, 0)),         # w1 (bf16)
                pl.BlockSpec((Cm, 1), lambda n: (0, 0)),         # s1
                pl.BlockSpec((Cm, 1), lambda n: (0, 0)),         # b1
                pl.BlockSpec((C, 9 * Cm), lambda n: (0, 0)),     # w2 (bf16)
                pl.BlockSpec((C, 1), lambda n: (0, 0)),          # s2
                pl.BlockSpec((C, 1), lambda n: (0, 0)),          # b2
                pl.BlockSpec((2, HW), lambda n: (0, 0)),         # edge masks
            ],
            out_specs=pl.BlockSpec((1, C, HW), lambda n: (n, 0, 0)),
            scratch_shapes=[
                pltpu.VMEM((Cm, PADL + HW + PADT), jnp.float32),  # padded act
            ],
        ),
        compiler_params=pltpu.CompilerParams(
            dimension_semantics=("parallel",),   # even extent -> both v7x TCs
            vmem_limit_bytes=32 * 1024 * 1024,
        ),
    )(x3, w1b, s1, b1, w2b, s2, b2, edge)

    return out.reshape(N, C, H, W)


def make_params(key, C):
    """Deterministic parameters matching the PyTorch module's shapes,
    pre-flattened to their final kernel layouts."""
    Cm = C // 2
    k1, k2 = jax.random.split(key)

    # Conv1: torch weight (Cm, C, 1, 1) -> (Cm, C)
    w1_oihw = 0.1 * jax.random.normal(k1, (Cm, C, 1, 1), jnp.float32)
    w1 = w1_oihw[:, :, 0, 0]                                       # (Cm, C)

    # Conv2: torch weight (C, Cm, 3, 3) -> (C, 3, 3, Cm) -> (C, 9*Cm)
    w2_oihw = 0.1 * jax.random.normal(k2, (C, Cm, 3, 3), jnp.float32)
    w2col = jnp.transpose(w2_oihw, (0, 2, 3, 1)).reshape(C, 9 * Cm)

    # BatchNorm params (deterministic, non-trivial), folded to scale/bias.
    def fold_bn(n):
        gamma = 1.0 + 0.05 * jnp.arange(n, dtype=jnp.float32)
        beta = 0.02 * jnp.arange(n, dtype=jnp.float32) - 0.1
        mean = 0.01 * jnp.arange(n, dtype=jnp.float32)
        var = 1.0 + 0.1 * jnp.arange(n, dtype=jnp.float32)
        scale = gamma / jnp.sqrt(var + BN_EPS)
        bias = beta - mean * scale
        return scale.reshape(n, 1), bias.reshape(n, 1)

    s1, b1 = fold_bn(Cm)
    s2, b2 = fold_bn(C)
    return w1, s1, b1, w2col, s2, b2


def reference(x, w1, s1, b1, w2col, s2, b2):
    """Pure-JAX NCHW reference (f32 convs via lax) for validation."""
    N, C, H, W = x.shape
    Cm = w1.shape[0]
    w1_oihw = w1[:, :, None, None]
    w2_oihw = jnp.transpose(w2col.reshape(C, 3, 3, Cm), (0, 3, 1, 2))

    h = lax.conv_general_dilated(x, w1_oihw, (1, 1), "VALID",
                                 dimension_numbers=("NCHW", "OIHW", "NCHW"))
    h = _leaky(h * s1[:, 0][None, :, None, None] + b1[:, 0][None, :, None, None])
    y = lax.conv_general_dilated(h, w2_oihw, (1, 1), "SAME",
                                 dimension_numbers=("NCHW", "OIHW", "NCHW"))
    y = _leaky(y * s2[:, 0][None, :, None, None] + b2[:, 0][None, :, None, None])
    return y + x


if __name__ == "__main__":
    N, C, H, W = 2, 16, 16, 16  # in_channels must be even (Cm = C // 2)
    key = jax.random.PRNGKey(0)
    kx, kp = jax.random.split(key)

    x = jax.random.normal(kx, (N, C, H, W), jnp.float32)
    params = make_params(kp, C)

    out = jax.block_until_ready(residual_layer(x, *params))
    ref = reference(x, *params)

    assert out.shape == (N, C, H, W)
    # bf16 MXU operands (f32 accumulation) -> tolerance looser than pure f32.
    err = float(jnp.max(jnp.abs(out - ref)))
    assert jnp.allclose(out, ref, atol=2e-2, rtol=2e-2), f"mismatch vs reference (max abs err {err})"

    print("KERNEL_OK")
</pallas_src>

<mosaic_0001>
module attributes {stable_mosaic.version = 11 : i64} {
  func.func @residual_kernel(%arg0: i32, %arg1: memref<1x16x256xf32, #tpu.memory_space<vmem>>, %arg2: memref<8x16xbf16, #tpu.memory_space<vmem>>, %arg3: memref<8x1xf32, #tpu.memory_space<vmem>>, %arg4: memref<8x1xf32, #tpu.memory_space<vmem>>, %arg5: memref<16x72xbf16, #tpu.memory_space<vmem>>, %arg6: memref<16x1xf32, #tpu.memory_space<vmem>>, %arg7: memref<16x1xf32, #tpu.memory_space<vmem>>, %arg8: memref<2x256xf32, #tpu.memory_space<vmem>>, %arg9: memref<1x16x256xf32, #tpu.memory_space<vmem>>, %arg10: memref<8x512xf32, #tpu.memory_space<vmem>>) attributes {dimension_semantics = [#tpu.dimension_semantics<parallel>], iteration_bounds = array<i64: 2>, scalar_prefetch = 0 : i64, scratch_operands = 1 : i64, tpu.core_type = #tpu.core_type<tc>, window_params = [{transform_indices = @transform_0, window_bounds = array<i64: 1, 16, 256>}, {pipeline_mode = #tpu.pipeline_mode<synchronous>, transform_indices = @transform_1, window_bounds = array<i64: 8, 16>}, {pipeline_mode = #tpu.pipeline_mode<synchronous>, transform_indices = @transform_2, window_bounds = array<i64: 8, 1>}, {pipeline_mode = #tpu.pipeline_mode<synchronous>, transform_indices = @transform_3, window_bounds = array<i64: 8, 1>}, {pipeline_mode = #tpu.pipeline_mode<synchronous>, transform_indices = @transform_4, window_bounds = array<i64: 16, 72>}, {pipeline_mode = #tpu.pipeline_mode<synchronous>, transform_indices = @transform_5, window_bounds = array<i64: 16, 1>}, {pipeline_mode = #tpu.pipeline_mode<synchronous>, transform_indices = @transform_6, window_bounds = array<i64: 16, 1>}, {pipeline_mode = #tpu.pipeline_mode<synchronous>, transform_indices = @transform_7, window_bounds = array<i64: 2, 256>}, {transform_indices = @transform_8, window_bounds = array<i64: 1, 16, 256>}]} {
    %c0 = arith.constant 0 : index
    %c0_0 = arith.constant 0 : index
    %c0_1 = arith.constant 0 : index
    %0 = vector.load %arg1[%c0, %c0_0, %c0_1] : memref<1x16x256xf32, #tpu.memory_space<vmem>>, vector<1x16x256xf32>
    %1 = vector.shape_cast %0 : vector<1x16x256xf32> to vector<16x256xf32>
    %c0_2 = arith.constant 0 : index
    %c0_3 = arith.constant 0 : index
    %2 = vector.load %arg2[%c0_2, %c0_3] : memref<8x16xbf16, #tpu.memory_space<vmem>>, vector<8x16xbf16>
    %3 = arith.truncf %1 : vector<16x256xf32> to vector<16x256xbf16>
    %cst = arith.constant dense<0.000000e+00> : vector<8x256xf32>
    %4 = tpu.matmul %2, %3, %cst {dimension_numbers = #tpu.dot_dimension_numbers<[1], [0], [0], [1], [0, 0, 1, 1], [], []>} : vector<8x16xbf16>, vector<16x256xbf16>, vector<8x256xf32> -> vector<8x256xf32>
    %c0_4 = arith.constant 0 : index
    %c0_5 = arith.constant 0 : index
    %5 = vector.load %arg3[%c0_4, %c0_5] : memref<8x1xf32, #tpu.memory_space<vmem>>, vector<8x1xf32>
    %6 = vector.broadcast %5 : vector<8x1xf32> to vector<8x256xf32>
    %7 = arith.mulf %4, %6 : vector<8x256xf32>
    %c0_6 = arith.constant 0 : index
    %c0_7 = arith.constant 0 : index
    %8 = vector.load %arg4[%c0_6, %c0_7] : memref<8x1xf32, #tpu.memory_space<vmem>>, vector<8x1xf32>
    %9 = vector.broadcast %8 : vector<8x1xf32> to vector<8x256xf32>
    %10 = arith.addf %7, %9 : vector<8x256xf32>
    %cst_8 = arith.constant 0.000000e+00 : f32
    %11 = vector.broadcast %cst_8 : f32 to vector<8x256xf32>
    %12 = arith.cmpf oge, %10, %11 : vector<8x256xf32>
    %cst_9 = arith.constant 0.00999999977 : f32
    %13 = vector.broadcast %cst_9 : f32 to vector<8x256xf32>
    %14 = arith.mulf %13, %10 : vector<8x256xf32>
    %15 = arith.select %12, %10, %14 : vector<8x256xi1>, vector<8x256xf32>
    %cst_10 = arith.constant 0.000000e+00 : f32
    %16 = vector.broadcast %cst_10 : f32 to vector<8x128xf32>
    %c0_11 = arith.constant 0 : index
    %c0_12 = arith.constant 0 : index
    %17 = vector.load %arg10[%c0_11, %c0_12] : memref<8x512xf32, #tpu.memory_space<vmem>>, vector<8x128xf32>
    tpu.vector_store %arg10[%c0_11, %c0_12], %16 {strides = array<i32>} : memref<8x512xf32, #tpu.memory_space<vmem>>, vector<8x128xf32>,
    %cst_13 = arith.constant 0.000000e+00 : f32
    %18 = vector.broadcast %cst_13 : f32 to vector<8x128xf32>
    %c0_14 = arith.constant 0 : index
    %c384 = arith.constant 384 : index
    %19 = vector.load %arg10[%c0_14, %c384] : memref<8x512xf32, #tpu.memory_space<vmem>>, vector<8x128xf32>
    tpu.vector_store %arg10[%c0_14, %c384], %18 {strides = array<i32>} : memref<8x512xf32, #tpu.memory_space<vmem>>, vector<8x128xf32>,
    %c0_15 = arith.constant 0 : index
    %c128 = arith.constant 128 : index
    %20 = vector.load %arg10[%c0_15, %c128] : memref<8x512xf32, #tpu.memory_space<vmem>>, vector<8x256xf32>
    tpu.vector_store %arg10[%c0_15, %c128], %15 {strides = array<i32>} : memref<8x512xf32, #tpu.memory_space<vmem>>, vector<8x256xf32>,
    %c0_16 = arith.constant 0 : index
    %c0_17 = arith.constant 0 : index
    %21 = vector.load %arg8[%c0_16, %c0_17] : memref<2x256xf32, #tpu.memory_space<vmem>>, vector<1x256xf32>
    %22 = vector.shape_cast %21 : vector<1x256xf32> to vector<1x256xf32>
    %23 = vector.broadcast %22 : vector<1x256xf32> to vector<8x256xf32>
    %c1 = arith.constant 1 : index
    %c0_18 = arith.constant 0 : index
    %24 = vector.load %arg8[%c1, %c0_18] : memref<2x256xf32, #tpu.memory_space<vmem>>, vector<1x256xf32>
    %25 = vector.shape_cast %24 : vector<1x256xf32> to vector<1x256xf32>
    %26 = vector.broadcast %25 : vector<1x256xf32> to vector<8x256xf32>
    %c0_19 = arith.constant 0 : index
    %c112 = arith.constant 112 : index
    %27 = vector.load %arg10[%c0_19, %c112] : memref<8x512xf32, #tpu.memory_space<vmem>>, vector<8x256xf32>
    %c1_i32 = arith.constant 1 : i32
    %28 = tpu.dynamic_rotate %27 by %c1_i32 dim 1 : vector<8x256xf32>, i32 -> vector<8x256xf32>
    %29 = arith.mulf %28, %23 : vector<8x256xf32>
    %c255_i32 = arith.constant 255 : i32
    %30 = tpu.dynamic_rotate %27 by %c255_i32 dim 1 : vector<8x256xf32>, i32 -> vector<8x256xf32>
    %31 = arith.mulf %30, %26 : vector<8x256xf32>
    %32 = arith.truncf %29 : vector<8x256xf32> to vector<8x256xbf16>
    %33 = arith.truncf %27 : vector<8x256xf32> to vector<8x256xbf16>
    %34 = arith.truncf %31 : vector<8x256xf32> to vector<8x256xbf16>
    %c0_20 = arith.constant 0 : index
    %c128_21 = arith.constant 128 : index
    %35 = vector.load %arg10[%c0_20, %c128_21] : memref<8x512xf32, #tpu.memory_space<vmem>>, vector<8x256xf32>
    %c1_i32_22 = arith.constant 1 : i32
    %36 = tpu.dynamic_rotate %35 by %c1_i32_22 dim 1 : vector<8x256xf32>, i32 -> vector<8x256xf32>
    %37 = arith.mulf %36, %23 : vector<8x256xf32>
    %c255_i32_23 = arith.constant 255 : i32
    %38 = tpu.dynamic_rotate %35 by %c255_i32_23 dim 1 : vector<8x256xf32>, i32 -> vector<8x256xf32>
    %39 = arith.mulf %38, %26 : vector<8x256xf32>
    %40 = arith.truncf %37 : vector<8x256xf32> to vector<8x256xbf16>
    %41 = arith.truncf %35 : vector<8x256xf32> to vector<8x256xbf16>
    %42 = arith.truncf %39 : vector<8x256xf32> to vector<8x256xbf16>
    %c0_24 = arith.constant 0 : index
    %c144 = arith.constant 144 : index
    %43 = vector.load %arg10[%c0_24, %c144] : memref<8x512xf32, #tpu.memory_space<vmem>>, vector<8x256xf32>
    %c1_i32_25 = arith.constant 1 : i32
    %44 = tpu.dynamic_rotate %43 by %c1_i32_25 dim 1 : vector<8x256xf32>, i32 -> vector<8x256xf32>
    %45 = arith.mulf %44, %23 : vector<8x256xf32>
    %c255_i32_26 = arith.constant 255 : i32
    %46 = tpu.dynamic_rotate %43 by %c255_i32_26 dim 1 : vector<8x256xf32>, i32 -> vector<8x256xf32>
    %47 = arith.mulf %46, %26 : vector<8x256xf32>
    %48 = arith.truncf %45 : vector<8x256xf32> to vector<8x256xbf16>
    %49 = arith.truncf %43 : vector<8x256xf32> to vector<8x256xbf16>
    %50 = arith.truncf %47 : vector<8x256xf32> to vector<8x256xbf16>
    %51 = tpu.concatenate %32, %33, %34, %40, %41, %42, %48, %49, %50 in 0 : vector<8x256xbf16>, vector<8x256xbf16>, vector<8x256xbf16>, vector<8x256xbf16>, vector<8x256xbf16>, vector<8x256xbf16>, vector<8x256xbf16>, vector<8x256xbf16>, vector<8x256xbf16> -> vector<72x256xbf16>
    %c0_27 = arith.constant 0 : index
    %c0_28 = arith.constant 0 : index
    %52 = vector.load %arg5[%c0_27, %c0_28] : memref<16x72xbf16, #tpu.memory_space<vmem>>, vector<16x72xbf16>
    %cst_29 = arith.constant dense<0.000000e+00> : vector<16x256xf32>
    %53 = tpu.matmul %52, %51, %cst_29 {dimension_numbers = #tpu.dot_dimension_numbers<[1], [0], [0], [1], [0, 0, 1, 1], [], []>} : vector<16x72xbf16>, vector<72x256xbf16>, vector<16x256xf32> -> vector<16x256xf32>
    %c0_30 = arith.constant 0 : index
    %c0_31 = arith.constant 0 : index
    %54 = vector.load %arg6[%c0_30, %c0_31] : memref<16x1xf32, #tpu.memory_space<vmem>>, vector<16x1xf32>
    %55 = vector.broadcast %54 : vector<16x1xf32> to vector<16x256xf32>
    %56 = arith.mulf %53, %55 : vector<16x256xf32>
    %c0_32 = arith.constant 0 : index
    %c0_33 = arith.constant 0 : index
    %57 = vector.load %arg7[%c0_32, %c0_33] : memref<16x1xf32, #tpu.memory_space<vmem>>, vector<16x1xf32>
    %58 = vector.broadcast %57 : vector<16x1xf32> to vector<16x256xf32>
    %59 = arith.addf %56, %58 : vector<16x256xf32>
    %cst_34 = arith.constant 0.000000e+00 : f32
    %60 = vector.broadcast %cst_34 : f32 to vector<16x256xf32>
    %61 = arith.cmpf oge, %59, %60 : vector<16x256xf32>
    %cst_35 = arith.constant 0.00999999977 : f32
    %62 = vector.broadcast %cst_35 : f32 to vector<16x256xf32>
    %63 = arith.mulf %62, %59 : vector<16x256xf32>
    %64 = arith.select %61, %59, %63 : vector<16x256xi1>, vector<16x256xf32>
    %65 = arith.addf %64, %1 : vector<16x256xf32>
    %c0_36 = arith.constant 0 : index
    %c0_37 = arith.constant 0 : index
    %c0_38 = arith.constant 0 : index
    %66 = vector.load %arg9[%c0_36, %c0_37, %c0_38] : memref<1x16x256xf32, #tpu.memory_space<vmem>>, vector<1x16x256xf32>
    %67 = vector.shape_cast %66 : vector<1x16x256xf32> to vector<16x256xf32>
    %68 = vector.shape_cast %65 : vector<16x256xf32> to vector<1x16x256xf32>
    tpu.vector_store %arg9[%c0_36, %c0_37, %c0_38], %68 {strides = array<i32>} : memref<1x16x256xf32, #tpu.memory_space<vmem>>, vector<1x16x256xf32>,
    return
  }
  func.func @transform_0(%arg0: i32) -> (i32, i32, i32) {
    %c0_i32 = arith.constant 0 : i32
    %c0_i32_0 = arith.constant 0 : i32
    %c0_i32_1 = arith.constant 0 : i32
    return %arg0, %c0_i32, %c0_i32_0 : i32, i32, i32
  }
  func.func @transform_1(%arg0: i32) -> (i32, i32) {
    %c0_i32 = arith.constant 0 : i32
    %c0_i32_0 = arith.constant 0 : i32
    %c0_i32_1 = arith.constant 0 : i32
    return %c0_i32, %c0_i32_0 : i32, i32
  }
  func.func @transform_2(%arg0: i32) -> (i32, i32) {
    %c0_i32 = arith.constant 0 : i32
    %c0_i32_0 = arith.constant 0 : i32
    %c0_i32_1 = arith.constant 0 : i32
    return %c0_i32, %c0_i32_0 : i32, i32
  }
  func.func @transform_3(%arg0: i32) -> (i32, i32) {
    %c0_i32 = arith.constant 0 : i32
    %c0_i32_0 = arith.constant 0 : i32
    %c0_i32_1 = arith.constant 0 : i32
    return %c0_i32, %c0_i32_0 : i32, i32
  }
  func.func @transform_4(%arg0: i32) -> (i32, i32) {
    %c0_i32 = arith.constant 0 : i32
    %c0_i32_0 = arith.constant 0 : i32
    %c0_i32_1 = arith.constant 0 : i32
    return %c0_i32, %c0_i32_0 : i32, i32
  }
  func.func @transform_5(%arg0: i32) -> (i32, i32) {
    %c0_i32 = arith.constant 0 : i32
    %c0_i32_0 = arith.constant 0 : i32
    %c0_i32_1 = arith.constant 0 : i32
    return %c0_i32, %c0_i32_0 : i32, i32
  }
  func.func @transform_6(%arg0: i32) -> (i32, i32) {
    %c0_i32 = arith.constant 0 : i32
    %c0_i32_0 = arith.constant 0 : i32
    %c0_i32_1 = arith.constant 0 : i32
    return %c0_i32, %c0_i32_0 : i32, i32
  }
  func.func @transform_7(%arg0: i32) -> (i32, i32) {
    %c0_i32 = arith.constant 0 : i32
    %c0_i32_0 = arith.constant 0 : i32
    %c0_i32_1 = arith.constant 0 : i32
    return %c0_i32, %c0_i32_0 : i32, i32
  }
  func.func @transform_8(%arg0: i32) -> (i32, i32, i32) {
    %c0_i32 = arith.constant 0 : i32
    %c0_i32_0 = arith.constant 0 : i32
    %c0_i32_1 = arith.constant 0 : i32
    return %arg0, %c0_i32, %c0_i32_0 : i32, i32, i32
  }
}

</mosaic_0001>

<bundles_post_ra>
// kernel: tpu_custom_call.1
= control target key start
LH: loop header
LB: loop body
LE: loop exit
PB: predicated region body
PF: predicated region fallthrough
CT: control target
= control target key end

     0   :  { %13 = vsyncpa [#allocation4], 0  ;;  %s1310_s0 = inlined_call_operand.hbm [shape: f32[2,16,256], index: 0, kind: input, shape index: {}]   ;;  %s1311_s1 = inlined_call_operand.vmem [shape: bf16[8,16], index: 1, kind: input, shape index: {}]   ;;  %s1312_s2 = inlined_call_operand.vmem [shape: f32[8,1], index: 2, kind: input, shape index: {}]   ;;  %s1313_s3 = inlined_call_operand.vmem [shape: f32[8,1], index: 3, kind: input, shape index: {}]   ;;  %s1314_s4 = inlined_call_operand.vmem [shape: bf16[16,72], index: 4, kind: input, shape index: {}]   ;;  %s1315_s5 = inlined_call_operand.vmem [shape: f32[16,1], index: 5, kind: input, shape index: {}]   ;;  %s1316_s6 = inlined_call_operand.vmem [shape: f32[16,1], index: 6, kind: input, shape index: {}]   ;;  %s1317_s7 = inlined_call_operand.vmem [shape: f32[2,256], index: 7, kind: input, shape index: {}]   ;;  %s1318_s8 = inlined_call_operand.hbm [shape: f32[2,16,256], index: 8, kind: output, shape index: {}]  }
   0x1   :  { %15 = vsyncpa [#allocation4 + $0x1], 0 }
   0x2   :  { %16 = vsyncpa [#allocation5], 0 }
   0x3   :  { %18 = vsyncpa [#allocation5 + $0x1], 0  ;;  %s1032_s27 = smov 0   ;;  %s1034_s28 = smov 0  }
   0x4   :  { %s1036_s29 = smov 0   ;;  %s1038_s30 = smov 0  }
   0x5 LB: > { %s1053_s9 = sadd.s32 4294967295, %s973_s30   ;;  %s801_s10 = sadd.s32 4294967294, %s973_s30   ;;  %s973_s30 = sphi %s1038_s30, %s1335_s30   ;;  %s969_s29 = sphi %s1036_s29, %s1334_s29   ;;  %s965_s28 = sphi %s1034_s28, %s1333_s28   ;;  %s961_s27 = sphi %s1032_s27, %s1332_s27  }
   0x6   : > { %s1057_s11 = sadd.s32 1, %s973_s30   ;;  %s31_s12 = sadd.s32 1, %s969_s29 }
   0x7   : > { %s28_s13 = ssub.s32 %s973_s30, %s1057_s11  ;;  %p38_p0 = scmp.ne.s32.totalorder %s969_s29, %s965_s28 }
   0x8   : > { %p29_p1 = scmp.eq.s32.totalorder %s28_s13, 0  ;;  %p39_p2 = scmp.eq.s32.totalorder %s973_s30, 0 }
   0x9   : > { %p44_p3 = scmp.ne.s32.totalorder %s965_s28, %s961_s27  ;;  %p45_p4 = scmp.eq.s32.totalorder %s1053_s9, 0 }
   0xa   : > { %s1069_s14 = scalar_select %p29_p1, %s969_s29, %s31_s12  }
   0xb   : > { %p1071_p5 = por %p39_p2, %p38_p0  ;;  %p1075_p6 = por %p45_p4, %p44_p3 }
   0xc   : > { %1321 = sst [smem:[#allocation9_spill]] %s1069_s14  ;;  %p215_p7 = scmp.eq.s32.totalorder %s1053_s9, 1 }
   0xd   : > { %s1323_s16 = scalar_select %p1075_p6, 1, 0 }
   0xe   : > { %p221_p8 = scmp.eq.s32.totalorder %s801_s10, 1  ;;  %p834_p10 = scmp.lt.s32.totalorder %s973_s30, 2 }
   0xf   : > { %p1082_p11 = por %p215_p7, %p38_p0  ;;  %s262_s19 = sand.u32 1, %s969_s29  }
  0x10   : > { %p1086_p12 = por %p221_p8, %p44_p3  ;;  %s820_s20 = sshll.u32 %s973_s30, 9 }
  0x11   : > { %s1324_s17 = scalar_select %p1082_p11, 1, 0 }
  0x12   : > { %s1325_s18 = scalar_select %p1086_p12, 1, 0 }
  0x13   : > { %s804_s21 = sshll.u32 %s262_s19, 5  ;;  %s1095_s24 = scalar_lea.hbm %s1310_s0, %s820_s20 }
  0x14   : > { %s266_s25 = scalar_lea.vmem [#allocation3], %s804_s21  ;;  %p1099_p13 = pnand %p834_p10, %p1071_p5 }
  0x15   : > { %s273_s26 = sshll.u32 %s266_s25, 4  ;;  %s1105_s12 = scalar_lea.sflag [#allocation4], %s262_s19  ;;  %s1103_s26 = int_to_ptr.vmem [resolvable:$true] %s273_s26 }
  0x16   : > { %s881_s13 = scalar_lea.hbm %s1095_s24, 512  ;;  %p883_p1 = pneg %p1099_p13 }
  0x17   : > { %p882_p0 = scmp.ne.s32.totalorder %s1095_s24, %s881_s13  ;;  %s886_s21 = scalar_lea.hbm %s1310_s0, 1024 }
  0x18   : > { %p887_p4 = scmp.lt.s32.totalorder %s1095_s24, %s1310_s0  ;;  %p888_p5 = scmp.lt.s32.totalorder %s886_s21, %s881_s13 }
  0x19   : > { %p884_p2 = pnand %p883_p1, %p882_p0 }
  0x1a   : > { %p889_p7 = por %p888_p5, %p887_p4 }
  0x1b   : > { %p885_p3 = pneg %p884_p2 }
  0x1d   : > { %p890_p8 = pnand %p889_p7, %p885_p3 }
  0x1f   : > { %893 = shalt.err (!%p890_p8)
}
  0x20   : > { %s894_s19 = scalar_lea.vmem %s1103_s26, 512  ;;  %s975_s25 = smov [#allocation3]  }
  0x21   : > { %p895_p10 = scmp.ne.s32.totalorder %s1103_s26, %s894_s19  ;;  %s899_s14 = sshll.u32 %s975_s25, 4  ;;  %s900_s14 = int_to_ptr.vmem [resolvable:$false] %s899_s14 }
  0x22   : > { %s901_s20 = scalar_lea.vmem %s900_s14, 1024  ;;  %p902_p2 = scmp.lt.s32.totalorder %s1103_s26, %s900_s14 }
  0x23   : > { %p897_p9 = pnand %p895_p10, %p883_p1  ;;  %p903_p12 = scmp.lt.s32.totalorder %s901_s20, %s894_s19 }
  0x25   : > { %p898_p0 = pneg %p897_p9  ;;  %p904_p11 = por %p903_p12, %p902_p2 }
  0x27   : > { %p905_p6 = pnand %p904_p11, %p898_p0 }
  0x29   : > { %908 = shalt.err (!%p905_p6)
}
  0x2a   : > { %s976_s13 = smov 256   ;;  %s977_s22 = smov 16  }
  0x2b   : > { %829 = dma.hbm_to_vmem [thread:$0]  (!%p1099_p13), %s1095_s24, 512, %s1103_s26, %s1105_s12, %s976_s13, %s976_s13, %s977_s22  }
  0x2c   : > { %p807_p9 = scmp.ge.s32.totalorder %s973_s30, 1  ;;  %p281_p1 = scmp.lt.s32.totalorder %s973_s30, 3 }
  0x2e   : > { %p282_p3 = pnand %p807_p9, %p281_p1 }
  0x2f   : > { %s1129_s14 = sand.u32 (!%p282_p3), 1, %s965_s28   ;;  %p1327_p6 = scmp.ne.s32.totalorder (!%p282_p3), %s1323_s16, 0 }
  0x30   : > { %285 = sbr.rel (%p282_p3) target bundleno = 748 (0x2ec), region = 52  ;;  %s808_s21 = sshll.u32 (!%p282_p3), %s1129_s14, 5 }
  0x31   : > { %s288_s15 = scalar_lea.sflag (!%p282_p3), [#allocation4], %s1129_s14  ;;  %s291_s23 = scalar_lea.vmem (!%p282_p3), [#allocation3], %s808_s21 }
  0x35   : > { %952 = dma.done.wait (%p1327_p6), %s288_s15, 512  }
  0x36   : > { %954 = vsyncadd (%p1327_p6), %s288_s15, 4294966784  ;;  %v978_v0 = vmov 0   ;;  %v1139_v1 = vld [vmem:[%s291_s23 + $0x8] sm:$0xff]  ;;  %v1141_v2 = vld [vmem:[%s291_s23 + $0x18] sm:$0xff]  ;;  %vm332_vm0 = vcmask 130048   ;;  %v979_v10 = vmov 0.0   ;;  %v405_v46 = vlaneseq }
  0x37   : > { %368 = vmatprep.mubr.bf16.mxu0 %v978_v0  ;;  %878 = vset.pattern.permute.xlu0 %v978_v0  ;;  %v1143_v3 = vld [vmem:[%s291_s23] sm:$0xff]  ;;  %v331_v4 = vpack.c.bf16 %v1141_v2, %v1139_v1  ;;  %v1147_v5 = vld [vmem:[%s291_s23 + $0x10] sm:$0xff]  ;;  %s980_s25 = smov 112   ;;  %s981_s20 = smov 16   ;;  %v983_v29 = vmov 0.0|0.0   ;;  %vm503_vm3 = vcmask 916480  }
  0x38   : > { %651 = vmatprep.mubr.bf16.mxu1 %v978_v0  ;;  %879 = vset.pattern.permute.xlu1 %v978_v0  ;;  %v377_v6 = vld [vmem:[%s1312_s2] sm:$0xff]  ;;  %v330_v7 = vpack.c.bf16 %v1147_v5, %v1143_v3  ;;  %s982_s13 = smov 127   ;;  %v534_v30 = vrot.slane %v983_v29, 4  ;;  %s984_s22 = smov 1   ;;  %v663_v43 = vld [vmem:[%s1315_s5 + $0x8] sm:$0xff]  ;;  %v406_v48 = vshrl.u32 %v405_v46, 7 }
  0x39   : > { %380 = vperm.xlu0 %878, %v377_v6   ;;  %350 = vmatprep.subr.bf16.mxu0 %v331_v4  ;;  %v385_v8 = vld [vmem:[%s1313_s3] sm:$0xff]  ;;  %v679_v44 = vld [vmem:[%s1316_s6 + $0x8] sm:$0xff]  ;;  %v1201_v50 = vand.u32 127, %v405_v46  ;;  %vm569_vm6 = vcmask 1043456   ;;  %vm609_vm7 = vcmask 588800   ;;  %s323_s26 = scalar_lea.vmem [#allocation6], %s808_s21 }
  0x3a   : > { %351 = vmatpush1.bf16.msra.mxu0 %v330_v7  ;;  %v329_v9 = vld [vmem:[%s1311_s1] sm:$0xf]  ;;  %v411_v51 = vsub.s32 1, %v406_v48  ;;  %v407_v54 = vsub.s32 0, %v406_v48  ;;  %s821_s16 = sshll.u32 %s1053_s9, 9  ;;  %s728_s10 = sshll.u32 %s323_s26, 4  ;;  %s1266_s10 = int_to_ptr.vmem [resolvable:$true] %s728_s10 }
  0x3b   : > { %v662_v41 = vld [vmem:[%s1315_s5] sm:$0xff]  ;;  %vm459_vm4 = vcmp.lt.s32.totalorder %v1201_v50, 127  ;;  %vm450_vm5 = vcmp.lt.s32.totalorder %v1201_v50, 1  ;;  %s1263_s21 = scalar_lea.hbm %s1318_s8, %s821_s16  ;;  %s715_s9 = scalar_lea.sflag [#allocation5], %s1129_s14 }
  0x3c   : > { %v678_v42 = vld [vmem:[%s1316_s6] sm:$0xff]  ;;  %p1328_p12 = scmp.ne.s32.totalorder %s1324_s17, 0 }
  0x3d   : > { %388 = vperm.xlu0 %878, %v385_v8   ;;  %810 = vmatmul.mubr.msk.bf16.vlgmr.msra.gmra.mxu0 %vm332_vm0, %v329_v9  ;;  %v811_v52 = vld [vmem:[%s1317_s7 + $0x1] ss:$2 sm:$0x3]  ;;  %v403_v58 = vld [vmem:[%s1317_s7] ss:$2 sm:$0x3] }
  0x3e   : > { %v425_v56 = vrot.slane %v811_v52, %v411_v51  ;;  %v421_v59 = vrot.slane %v811_v52, %v407_v54  ;;  %v408_v6 = vrot.slane %v403_v58, %v407_v54  ;;  %v412_v8 = vrot.slane %v403_v58, %v411_v51 }
  0x41   : > { %501 = vrot.lane.b32.xlu0 %v979_v10, %s980_s25 }
  0xb4   : > { %v381_v11 = vpop.permute.xlu0 %380 }
  0xb8   : > { %v389_v14 = vpop.permute.xlu0 %388 }
  0xbc   : > { %v502_v32 = vpop.permute.xlu0 %501 }
  0xfd   : > { %v370_v12 = vpop.f32.mrf.mxu0 }
  0xfe   : > { %v383_v13 = vmul.f32 %v381_v11, %v370_v12 }
  0xff   : > { %v372_v15 = vpop.f32.mrf.mxu0 }
 0x100   : > { %v391_v16 = vadd.f32 %v389_v14, %v383_v13  ;;  %v384_v17 = vmul.f32 %v381_v11, %v372_v15 }
 0x101   : > { %v374_v18 = vpop.f32.mrf.mxu0 }
 0x102   : > { %vm393_vm1 = vcmp.ge.f32.partialorder %v391_v16, 0.0  ;;  %v395_v19 = vmul.f32 0.01, %v391_v16  ;;  %v392_v20 = vadd.f32 %v389_v14, %v384_v17 }
 0x103   : > { %v375_v21 = vpop.f32.mrf.mxu0 }
 0x104   : > { %v396_v22 = vmul.f32 0.01, %v392_v20  ;;  %v397_v23 = vsel %vm393_vm1, %v391_v16, %v395_v19  ;;  %vm394_vm2 = vcmp.ge.f32.partialorder %v392_v20, 0.0 }
 0x105   : > { %436 = vrot.lane.b32.xlu0 %v397_v23, %s981_s20  ;;  %497 = vrot.lane.b32.xlu1 %v397_v23, %s980_s25  ;;  %v1164_v24 = vpack.c.bf16 %v397_v23, %v397_v23 }
 0x106   : > { %v398_v25 = vsel %vm394_vm2, %v392_v20, %v396_v22 }
 0x107   : > { %v535_v26 = vrot.slane %v1164_v24, 4  ;;  %v1169_v27 = vpack.c.bf16 %v398_v25, %v398_v25 }
 0x109   : > { %479 = vrot.lane.b32.xlu0 %v397_v23, %s982_s13  ;;  %499 = vrot.lane.b32.xlu1 %v398_v25, %s980_s25  ;;  %v536_v28 = vrot.slane %v1169_v27, 4 }
 0x10d   : > { %560 = vrot.lane.b32.xlu0 %v535_v26, %s980_s25  ;;  %434 = vrot.lane.b32.xlu1 %v979_v10, %s981_s20 }
 0x111   : > { %438 = vrot.lane.b32.xlu1 %v398_v25, %s981_s20  ;;  %562 = vrot.lane.b32.xlu0 %v536_v28, %s980_s25 }
 0x115   : > { %564 = vrot.lane.b32.xlu1 %v534_v30, %s980_s25  ;;  %s909_s25 = scalar_lea.vmem %s1266_s10, 512 }
 0x116   : > { %p910_p11 = scmp.ne.s32.totalorder %s1266_s10, %s909_s25 }
 0x118   : > { %p911_p13 = pnand %p910_p11, %p1328_p12 }
 0x119   : > { %481 = vrot.lane.b32.xlu1 %v398_v25, %s982_s13 }
 0x11a   : > { %p912_p4 = pneg %p911_p13 }
 0x177   : > { %v498_v31 = vpop.permute.xlu1 %497  ;;  %v437_v38 = vpop.permute.xlu0 %436 }
 0x17b   : > { %v500_v33 = vpop.permute.xlu1 %499  ;;  %v480_v45 = vpop.permute.xlu0 %479 }
 0x17c   : > { %v505_v34 = vsel %vm503_vm3, %v500_v33, %v502_v32  ;;  %v504_v35 = vsel %vm503_vm3, %v498_v31, %v500_v33 }
 0x17d   : > { %518 = vrot.lane.b32.xlu1 %v505_v34, %s982_s13  ;;  %516 = vrot.lane.b32.xlu0 %v504_v35, %s982_s13 }
 0x17f   : > { %v435_v36 = vpop.permute.xlu1 %434  ;;  %v561_v49 = vpop.permute.xlu0 %560 }
 0x180   : > { %v440_v39 = vsel %vm332_vm0, %v435_v36, %v437_v38 }
 0x181   : > { %510 = vrot.lane.b32.xlu1 %v505_v34, %s984_s22  ;;  %508 = vrot.lane.b32.xlu0 %v504_v35, %s984_s22 }
 0x183   : > { %v439_v37 = vpop.permute.xlu1 %438  ;;  %v563_v55 = vpop.permute.xlu0 %562 }
 0x184   : > { %v441_v40 = vsel %vm332_vm0, %v437_v38, %v439_v37  ;;  %v567_v29 = vsel %vm503_vm3, %v561_v49, %v563_v55 }
 0x185   : > { %471 = vrot.lane.b32.xlu1 %v397_v23, %s984_s22  ;;  %473 = vrot.lane.b32.xlu0 %v398_v25, %s984_s22 }
 0x187   : > { %v565_v47 = vpop.permute.xlu1 %564 }
 0x189   : > { %455 = vrot.lane.b32.xlu1 %v440_v39, %s982_s13  ;;  %457 = vrot.lane.b32.xlu0 %v441_v40, %s982_s13  ;;  %s985_s13 = smov [#allocation6]  }
 0x18b   : > { %v482_v53 = vpop.permute.xlu1 %481 }
 0x18c   : > { %v484_v57 = vsel %vm459_vm4, %v482_v53, %v480_v45  ;;  %v483_v60 = vsel %vm459_vm4, %v480_v45, %v482_v53 }
 0x18d   : > { %444 = vrot.lane.b32.xlu1 %v440_v39, %s984_s22  ;;  %446 = vrot.lane.b32.xlu0 %v441_v40, %s984_s22  ;;  %v486_v61 = vmul.f32 %v484_v57, %v425_v56  ;;  %v485_v10 = vmul.f32 %v483_v60, %v421_v59  ;;  %s913_s22 = sshll.u32 %s985_s13, 4  ;;  %s914_s22 = int_to_ptr.vmem [resolvable:$false] %s913_s22 }
 0x18e   : > { %s915_s15 = scalar_lea.vmem %s914_s22, 1024  ;;  %p916_p5 = scmp.lt.s32.totalorder %s1266_s10, %s914_s22 }
 0x18f   : > { %v490_v11 = vpack.c.bf16 %v486_v61, %v486_v61  ;;  %v489_v21 = vpack.c.bf16 %v485_v10, %v485_v10  ;;  %p917_p7 = scmp.lt.s32.totalorder %s915_s15, %s909_s25 }
 0x191   : > { %539 = vrot.lane.b32.xlu1 %v535_v26, %s981_s20  ;;  %541 = vrot.lane.b32.xlu0 %v536_v28, %s981_s20  ;;  %v553_v22 = vrot.slane %v490_v11, 4  ;;  %v552_v37 = vrot.slane %v489_v21, 4  ;;  %p918_p8 = por %p917_p7, %p916_p5 }
 0x193   : > { %p919_p10 = pnand %p918_p8, %p912_p4 }
 0x195   : > { %537 = vrot.lane.b32.xlu1 %v534_v30, %s981_s20  ;;  %666 = vperm.xlu0 %878, %v662_v41   ;;  %v568_v30 = vsel %vm503_vm3, %v563_v55, %v565_v47  ;;  %v588_v47 = vsel %vm569_vm6, %v1164_v24, %v552_v37 }
 0x199   : > { %682 = vperm.xlu0 %878, %v678_v42   ;;  %671 = vperm.xlu1 %879, %v663_v43   ;;  %v592_v42 = vsel %vm569_vm6, %v1169_v27, %v553_v22 }
 0x19d   : > { %687 = vperm.xlu1 %879, %v679_v44  }
 0x1ef   : > { %v519_v62 = vpop.permute.xlu1 %518  ;;  %v517_v63 = vpop.permute.xlu0 %516 }
 0x1f0   : > { %v520_v0 = vsel %vm459_vm4, %v517_v63, %v519_v62  ;;  %v521_v4 = vsel %vm459_vm4, %v519_v62, %v517_v63 }
 0x1f1   : > { %v522_v7 = vmul.f32 %v520_v0, %v421_v59  ;;  %v523_v9 = vmul.f32 %v521_v4, %v425_v56 }
 0x1f3   : > { %v511_v12 = vpop.permute.xlu1 %510  ;;  %v509_v13 = vpop.permute.xlu0 %508  ;;  %v530_v14 = vpack.c.bf16 %v523_v9, %v523_v9  ;;  %v529_v15 = vpack.c.bf16 %v522_v7, %v522_v7 }
 0x1f4   : > { %v512_v16 = vsel %vm450_vm5, %v509_v13, %v511_v12  ;;  %v513_v17 = vsel %vm450_vm5, %v511_v12, %v509_v13 }
 0x1f5   : > { %v514_v18 = vmul.f32 %v513_v17, %v408_v6  ;;  %v515_v19 = vmul.f32 %v512_v16, %v412_v8  ;;  %813 = vmatprep.subr.msk.bf16.mxu1 %vm569_vm6, %v530_v14  ;;  %v614_v20 = vsel %vm569_vm6, %v529_v15, 0 }
 0x1f6   : > { %626 = vmatpush1.bf16.msra.mxu1 %v614_v20 }
 0x1f7   : > { %v524_v23 = vpack.c.bf16 %v514_v18, %v514_v18  ;;  %v525_v25 = vpack.c.bf16 %v515_v19, %v515_v19  ;;  %v472_v26 = vpop.permute.xlu1 %471  ;;  %v474_v28 = vpop.permute.xlu0 %473 }
 0x1f8   : > { %v475_v31 = vsel %vm450_vm5, %v472_v26, %v474_v28  ;;  %v476_v32 = vsel %vm450_vm5, %v474_v28, %v472_v26 }
 0x1f9   : > { %v477_v33 = vmul.f32 %v476_v32, %v408_v6  ;;  %v478_v34 = vmul.f32 %v475_v31, %v412_v8  ;;  %v600_v35 = vsel %vm569_vm6, %v525_v25, %v568_v30  ;;  %v596_v36 = vsel %vm569_vm6, %v524_v23, %v567_v29 }
 0x1fa   : > { %627 = vmatprep.subr.bf16.mxu1 %v600_v35 }
 0x1fb   : > { %v487_v38 = vpack.c.bf16 %v477_v33, %v477_v33  ;;  %v488_v39 = vpack.c.bf16 %v478_v34, %v478_v34  ;;  %v456_v40 = vpop.permute.xlu1 %455  ;;  %628 = vmatpush1.bf16.msra.mxu1 %v596_v36  ;;  %v458_v41 = vpop.permute.xlu0 %457 }
 0x1fc   : > { %v460_v43 = vsel %vm459_vm4, %v456_v40, %v458_v41  ;;  %v461_v44 = vsel %vm459_vm4, %v458_v41, %v456_v40  ;;  %629 = vmatprep.subr.bf16.mxu1 %v592_v42 }
 0x1fd   : > { %v462_v45 = vmul.f32 %v460_v43, %v421_v59  ;;  %v463_v46 = vmul.f32 %v461_v44, %v425_v56  ;;  %v548_v48 = vrot.slane %v487_v38, 4  ;;  %v549_v49 = vrot.slane %v488_v39, 4 }
 0x1ff   : > { %v469_v51 = vpack.c.bf16 %v462_v45, %v462_v45  ;;  %v470_v52 = vpack.c.bf16 %v463_v46, %v463_v46  ;;  %v445_v53 = vpop.permute.xlu1 %444  ;;  %630 = vmatpush1.bf16.msra.mxu1 %v588_v47  ;;  %v447_v54 = vpop.permute.xlu0 %446 }
 0x200   : > { %v451_v27 = vsel %vm450_vm5, %v445_v53, %v447_v54  ;;  %v452_v55 = vsel %vm450_vm5, %v447_v54, %v445_v53 }
 0x201   : > { %v454_v57 = vmul.f32 %v451_v27, %v412_v8  ;;  %v584_v58 = vsel %vm569_vm6, %v470_v52, %v549_v49  ;;  %v580_v56 = vsel %vm569_vm6, %v469_v51, %v548_v48  ;;  %v453_v24 = vmul.f32 %v452_v55, %v408_v6  ;;  %v880_v8 = vld [vmem:[%s1314_s4] sm:$0xff]  }
 0x202   : > { %631 = vmatprep.subr.bf16.mxu1 %v584_v58 }
 0x203   : > { %v465_v59 = vpack.c.bf16 %v454_v57, %v454_v57  ;;  %v540_v60 = vpop.permute.xlu1 %539  ;;  %632 = vmatpush1.bf16.msra.mxu1 %v580_v56  ;;  %v542_v61 = vpop.permute.xlu0 %541  ;;  %v464_v0 = vpack.c.bf16 %v453_v24, %v453_v24 }
 0x204   : > { %v545_v62 = vsel %vm332_vm0, %v540_v60, %v542_v61 }
 0x205   : > { %v576_v63 = vsel %vm569_vm6, %v465_v59, %v545_v62 }
 0x206   : > { %633 = vmatprep.subr.bf16.mxu1 %v576_v63 }
 0x207   : > { %v538_v4 = vpop.permute.xlu1 %537 }
 0x208   : > { %v544_v50 = vsel %vm332_vm0, %v538_v4, %v540_v60 }
 0x209   : > { %v572_v7 = vsel %vm569_vm6, %v464_v0, %v544_v50 }
 0x20a   : > { %634 = vmatpush1.bf16.msra.mxu1 %v572_v7 }
 0x20d   : > { %814 = vmatmul.mubr.msk.bf16.vlgmr.msra.gmra.mxu1 %vm609_vm7, %v880_v8 }
 0x210   : > { %v667_v6 = vpop.permute.xlu0 %666 }
 0x214   : > { %v672_v9 = vpop.permute.xlu1 %671  ;;  %v683_v12 = vpop.permute.xlu0 %682 }
 0x218   : > { %v688_v20 = vpop.permute.xlu1 %687 }
 0x2cd   : > { %v653_v10 = vpop.f32.mrf.mxu1 }
 0x2ce   : > { %v674_v11 = vmul.f32 %v667_v6, %v653_v10 }
 0x2cf   : > { %v655_v13 = vpop.f32.mrf.mxu1 }
 0x2d0   : > { %v690_v14 = vadd.f32 %v683_v12, %v674_v11  ;;  %v675_v15 = vmul.f32 %v667_v6, %v655_v13 }
 0x2d1   : > { %v657_v16 = vpop.f32.mrf.mxu1 }
 0x2d2   : > { %vm694_vm8 = vcmp.ge.f32.partialorder %v690_v14, 0.0  ;;  %v698_v17 = vmul.f32 0.01, %v690_v14  ;;  %v691_v18 = vadd.f32 %v683_v12, %v675_v15  ;;  %v676_v19 = vmul.f32 %v672_v9, %v657_v16 }
 0x2d3   : > { %v659_v21 = vpop.f32.mrf.mxu1 }
 0x2d4   : > { %v702_v22 = vsel %vm694_vm8, %v690_v14, %v698_v17  ;;  %vm695_vm9 = vcmp.ge.f32.partialorder %v691_v18, 0.0  ;;  %v699_v23 = vmul.f32 0.01, %v691_v18  ;;  %v692_v25 = vadd.f32 %v688_v20, %v676_v19 }
 0x2d5   : > { %v706_v26 = vadd.f32 %v702_v22, %v1143_v3  ;;  %v677_v28 = vmul.f32 %v672_v9, %v659_v21 }
 0x2d6   : > { %v703_v29 = vsel %vm695_vm9, %v691_v18, %v699_v23  ;;  %vm696_vm10 = vcmp.ge.f32.partialorder %v692_v25, 0.0  ;;  %v700_v30 = vmul.f32 0.01, %v692_v25 }
 0x2d7   : > { %710 = vst [vmem:[%s323_s26] sm:$0xff] %v706_v26  ;;  %v707_v31 = vadd.f32 %v703_v29, %v1139_v1  ;;  %v693_v32 = vadd.f32 %v688_v20, %v677_v28 }
 0x2d8   : > { %v704_v33 = vsel %vm696_vm10, %v692_v25, %v700_v30 }
 0x2d9   : > { %711 = vst [vmem:[%s323_s26 + $0x8] sm:$0xff] %v707_v31  ;;  %v708_v34 = vadd.f32 %v704_v33, %v1147_v5  ;;  %vm697_vm11 = vcmp.ge.f32.partialorder %v693_v32, 0.0  ;;  %v701_v35 = vmul.f32 0.01, %v693_v32 }
 0x2db   : > { %712 = vst [vmem:[%s323_s26 + $0x10] sm:$0xff] %v708_v34  ;;  %v705_v3 = vsel %vm697_vm11, %v693_v32, %v701_v35 }
 0x2dc   : > { %v709_v36 = vadd.f32 %v705_v3, %v1141_v2 }
 0x2de   : > { %713 = vst [vmem:[%s323_s26 + $0x18] sm:$0xff] %v709_v36 }
 0x2df   : > { %922 = shalt.err (!%p919_p10)
}
 0x2e0   : > { %s923_s23 = scalar_lea.hbm %s1263_s21, 512  ;;  %s927_s16 = scalar_lea.hbm %s1318_s8, 1024 }
 0x2e1   : > { %p924_p0 = scmp.ne.s32.totalorder %s1263_s21, %s923_s23  ;;  %p928_p1 = scmp.lt.s32.totalorder %s1263_s21, %s1318_s8 }
 0x2e2   : > { %p929_p3 = scmp.lt.s32.totalorder %s927_s16, %s923_s23 }
 0x2e3   : > { %p925_p2 = pnand %p924_p0, %p1328_p12 }
 0x2e4   : > { %p930_p6 = por %p929_p3, %p928_p1 }
 0x2e5   : > { %p926_p9 = pneg %p925_p2 }
 0x2e7   : > { %p931_p11 = pnand %p930_p6, %p926_p9 }
 0x2e9   : > { %934 = shalt.err (!%p931_p11)
}
 0x2ea   : > { %s986_s25 = smov 256  }
 0x2eb   : > { %824 = dma.vmem_to_hbm [thread:$0]  (%p1328_p12), %s1266_s10, 512, %s1263_s21, %s715_s9, %s986_s25, %s986_s25, %s981_s20  }
 0x2ec PF: > { %s743_s13 = sand.u32 1, %s961_s27   ;;  %p1329_p13 = scmp.ne.s32.totalorder %s1325_s18, 0 }
 0x2ed   : > { %p1330_p4 = scmp.ge.s32.totalorder %s973_s30, 2  ;;  %s744_s22 = scalar_lea.sflag [#allocation5], %s743_s13 }
 0x2ef   : > { %p831_p5 = pnand %p1330_p4, %p1329_p13 }
 0x2f1   : > { %p832_p7 = pneg %p831_p5 }
 0x2f3   : > { %956 = dma.done.wait (%p832_p7), %s744_s22, 512  }
 0x2f4   : > { %958 = vsyncadd (%p832_p7), %s744_s22, 4294966784  ;;  %s1331_s17 = sld [smem:[#allocation9_spill]]  ;;  %p21_p8 = scmp.ge.s32.totalorder %s1057_s11, 4  }
 0x2f5   : > { %s1332_s27 = smov %s965_s28  ;;  %s1333_s28 = smov %s969_s29 }
 0x2f6   : > { %s1335_s30 = smov %s1057_s11  ;;  %23 = sbr.rel (!%p21_p8) target bundleno = 5 (0x5), region = 98 }
 0x2fa   : > { %s1334_s29 = smov %s1331_s17 }
 0x2fb   :  { %749 = vsyncpa [#allocation4], 1 }
 0x2fc   :  { %751 = vsyncpa [#allocation4 + $0x1], 1 }
 0x2fd   :  { %752 = vsyncpa [#allocation5], 1 }
 0x2fe   :  { %754 = vsyncpa [#allocation5 + $0x1], 1 }

</bundles_post_ra>
